<compile_context>
chip_gen: v5e
topology: v5e:2x2
jax: 0.10.0
libtpu: 0.0.40
codegen_flags: <defaults>
</compile_context>

<pallas_src>
import numpy as np
import jax
import jax.numpy as jnp
from jax import lax
from jax.experimental import pallas as pl
from jax.experimental.pallas import tpu as pltpu

SIZE = 1024          # ROBE table size (power of two -> hash wrap via bitmask)
NUM_HASHES = 2
CHUNK = 8            # chunk_size
BATCH = 16

LANE = 128


def _cdiv(a, b):
    return (a + b - 1) // b


def _plan_cols(cols, cap):
    """Pick a lane-dense (multiple-of-128) column tile `tc` and padded column count.
    Guarantees unmasked 128-lane stores and, once the problem is large enough to split,
    >= 2 grid steps so both v7x TensorCores get work."""
    cap = max(LANE, (cap // LANE) * LANE)
    if cols <= LANE:
        return LANE, LANE
    if cols <= 2 * cap:
        tc = min(cap, _cdiv(_cdiv(cols, 2), LANE) * LANE)   # aim for ~2 tiles
    else:
        tc = cap
    cols_p = _cdiv(cols, tc) * tc
    return tc, cols_p


def _bf16_planes(x_f32):
    """Split f32 -> 3 bf16 planes with hi + mid + lo == x to ~2^-24 relative error."""
    hi = x_f32.astype(jnp.bfloat16)
    e1 = x_f32 - hi.astype(jnp.float32)
    mid = e1.astype(jnp.bfloat16)
    e2 = e1 - mid.astype(jnp.float32)
    lo = e2.astype(jnp.bfloat16)
    return hi, mid, lo


def robe_embedding(ids, table, hash_mults, hash_biases, chunk_size,
                   max_cols_per_step=2048):
    """Pallas wrapper. ids: (B,) int32. Returns (B, num_hashes * chunk_size) float32."""
    B = int(ids.shape[0])
    H = int(hash_mults.shape[0])
    C = int(chunk_size)
    size = int(table.shape[0])
    assert size & (size - 1) == 0, "synthetic MultiHash assumes power-of-two table size"
    assert C & (C - 1) == 0 and size % C == 0, "two-level gather needs C | size, C pow2"
    Q = size // C                      # number of C-aligned windows (128 here)
    cols = B * H                       # one column per (batch, hash) pair, j = b*H + h
    c_bits = C.bit_length() - 1

    # --- glue (plain XLA, tiny, one-time) ---------------------------------------------
    # Hash folded out of the kernel: single start-index row, padded to lane-dense width.
    starts = (ids.astype(jnp.int32)[:, None] * hash_mults.astype(jnp.int32)[None, :]
              + hash_biases.astype(jnp.int32)[None, :]) & (size - 1)          # (B, H)
    tc, cols_p = _plan_cols(cols, max_cols_per_step)
    starts_row = jnp.zeros((1, cols_p), jnp.int32).at[0, :cols].set(starts.reshape(-1))

    # Pre-shifted windowed table: wt[rr*C + c, q] = table[(C*q + c + rr) % size].
    # Row blocks rr = 0..C-1 are the C possible residual shifts, so the kernel only
    # ever slices at multiples of C (= sublane-tile aligned).
    k = jnp.arange(C * C, dtype=jnp.int32)
    off = (k % C) + (k // C)                                         # c + rr per row
    qv = jnp.arange(Q, dtype=jnp.int32)
    widx = (C * qv[None, :] + off[:, None]) % size                   # (C*C, Q)
    wt = table.astype(jnp.float32)[widx]                             # (C*C, Q)
    hi, mid, lo = _bf16_planes(wt)
    planes = jnp.concatenate([hi, mid, lo], axis=0)                  # (3*C*C, Q) bf16

    grid = (cols_p // tc,)
    CC = C * C

    def kernel(starts_ref, planes_ref, out_ref):
        """starts: (1, tc) i32;  planes: (3*C*C, Q) bf16;  out: (C, tc) f32."""
        s = starts_ref[...]                                   # (1, tc)
        q = s >> c_bits                                       # window index in [0, Q)
        r = s & (C - 1)                                       # residual in [0, C)
        rows = lax.broadcasted_iota(jnp.int32, (Q, tc), 0)    # (Q, tc)
        onehot = (rows == q).astype(jnp.bfloat16)             # exact 0/1, K = Q = 128
        # Gather == one-hot matmul on the MXU (native bf16, f32 accumulate).
        g_all = jnp.dot(planes_ref[...], onehot,
                        preferred_element_type=jnp.float32)   # (3*C*C, tc) f32
        # Recombine the bf16 hi/mid/lo planes (tile-aligned slices).
        g = g_all[0:CC, :] + g_all[CC:2 * CC, :] + g_all[2 * CC:3 * CC, :]   # (C*C, tc)
        # Resolve the residual: out[c, j] = g[r_j*C + c, j]; all slabs C-row aligned.
        out = g[0:C, :]
        for rr in range(1, C):
            out = jnp.where(r == rr, g[rr * C:(rr + 1) * C, :], out)
        out_ref[...] = out

    out_t = pl.pallas_call(
        kernel,
        out_shape=jax.ShapeDtypeStruct((C, cols_p), jnp.float32),
        grid=grid,
        in_specs=[
            pl.BlockSpec((1, tc), lambda i: (0, i)),              # start indices (lanes = cols)
            pl.BlockSpec((3 * CC, Q), lambda i: (0, 0)),          # windowed table planes (resident)
        ],
        out_specs=pl.BlockSpec((C, tc), lambda i: (0, i)),        # lane-dense, unmasked stores
        compiler_params=pltpu.CompilerParams(
            dimension_semantics=("parallel",)),
    )(starts_row, planes)                                          # (C, cols_p), [c, b*H + h]

    # layout plumbing back to the PyTorch output: [c, b*H + h] -> [b, h*C + c]
    out = out_t[:, :cols]
    return out.reshape(C, B, H).transpose(1, 2, 0).reshape(B, H * C)


def robe_reference(ids, table, hash_mults, hash_biases, chunk_size):
    """Plain-JAX reference matching the PyTorch forward (hash -> get_slices -> flatten)."""
    size = table.shape[0]
    starts = (ids[:, None] * hash_mults[None, :] + hash_biases[None, :]) & (size - 1)  # (B, H)
    rot = (starts[:, :, None] + jnp.arange(chunk_size)[None, None, :]) % size          # (B, H, C)
    sl = jnp.take(table, rot, axis=0)                                                  # (B, H, C)
    return sl.reshape(ids.shape[0], -1)                                                # (B, H*C)


if __name__ == "__main__":
    key = jax.random.PRNGKey(0)
    k_tab, k_ids, k_a, k_b = jax.random.split(key, 4)

    # Parameter init per RobeEmbedding.reset_parameters: uniform(-dim^-0.5, dim^-0.5),
    # dim = chunk_size * num_hashes.
    dim = CHUNK * NUM_HASHES
    bound = dim ** (-0.5)
    table = jax.random.uniform(k_tab, (SIZE,), jnp.float32, minval=-bound, maxval=bound)

    # Deterministic synthetic MultiHash parameters (odd multipliers, bounded so
    # a*x + b stays well inside int32 for this id range).
    hash_mults = (jax.random.randint(k_a, (NUM_HASHES,), 1, 15000) * 2 + 1).astype(jnp.int32)
    hash_biases = jax.random.randint(k_b, (NUM_HASHES,), 0, SIZE).astype(jnp.int32)

    # Input ids.
    ids = jax.random.randint(k_ids, (BATCH,), 0, 20000).astype(jnp.int32)

    out = robe_embedding(ids, table, hash_mults, hash_biases, CHUNK)
    out = jax.block_until_ready(out)

    ref = robe_reference(ids, table, hash_mults, hash_biases, CHUNK)
    np.testing.assert_allclose(np.asarray(out), np.asarray(ref), rtol=1e-5, atol=1e-6)
    assert out.shape == (BATCH, NUM_HASHES * CHUNK)

    print("KERNEL_OK")
</pallas_src>

<mosaic_0001>
module attributes {stable_mosaic.version = 11 : i64} {
  func.func @kernel(%arg0: i32, %arg1: memref<1x128xi32, #tpu.memory_space<vmem>>, %arg2: memref<192x128xbf16, #tpu.memory_space<vmem>>, %arg3: memref<8x128xf32, #tpu.memory_space<vmem>>) attributes {dimension_semantics = [#tpu.dimension_semantics<parallel>], iteration_bounds = array<i64: 1>, scalar_prefetch = 0 : i64, scratch_operands = 0 : i64, tpu.core_type = #tpu.core_type<tc>, window_params = [{transform_indices = @transform_0, window_bounds = array<i64: 1, 128>}, {pipeline_mode = #tpu.pipeline_mode<synchronous>, transform_indices = @transform_1, window_bounds = array<i64: 192, 128>}, {transform_indices = @transform_2, window_bounds = array<i64: 8, 128>}]} {
    %c0 = arith.constant 0 : index
    %c0_0 = arith.constant 0 : index
    %0 = vector.load %arg1[%c0, %c0_0] : memref<1x128xi32, #tpu.memory_space<vmem>>, vector<1x128xi32>
    %c3_i32 = arith.constant 3 : i32
    %1 = vector.broadcast %c3_i32 : i32 to vector<1x128xi32>
    %2 = arith.shrsi %0, %1 : vector<1x128xi32>
    %c7_i32 = arith.constant 7 : i32
    %3 = vector.broadcast %c7_i32 : i32 to vector<1x128xi32>
    %4 = arith.andi %0, %3 : vector<1x128xi32>
    %5 = tpu.iota {dimensions = array<i32: 0>} : vector<128x128xi32>
    %6 = vector.broadcast %2 : vector<1x128xi32> to vector<128x128xi32>
    %7 = arith.cmpi eq, %5, %6 : vector<128x128xi32>
    %8 = arith.extui %7 : vector<128x128xi1> to vector<128x128xi32>
    %9 = arith.sitofp %8 : vector<128x128xi32> to vector<128x128xf32>
    %10 = arith.truncf %9 : vector<128x128xf32> to vector<128x128xbf16>
    %c0_1 = arith.constant 0 : index
    %c0_2 = arith.constant 0 : index
    %11 = vector.load %arg2[%c0_1, %c0_2] : memref<192x128xbf16, #tpu.memory_space<vmem>>, vector<192x128xbf16>
    %cst = arith.constant dense<0.000000e+00> : vector<192x128xf32>
    %12 = tpu.matmul %11, %10, %cst {dimension_numbers = #tpu.dot_dimension_numbers<[1], [0], [0], [1], [0, 0, 1, 1], [], []>} : vector<192x128xbf16>, vector<128x128xbf16>, vector<192x128xf32> -> vector<192x128xf32>
    %13 = vector.extract_strided_slice %12 {offsets = [0, 0], sizes = [64, 128], strides = [1, 1]} : vector<192x128xf32> to vector<64x128xf32>
    %14 = vector.extract_strided_slice %12 {offsets = [64, 0], sizes = [64, 128], strides = [1, 1]} : vector<192x128xf32> to vector<64x128xf32>
    %15 = arith.addf %13, %14 : vector<64x128xf32>
    %16 = vector.extract_strided_slice %12 {offsets = [128, 0], sizes = [64, 128], strides = [1, 1]} : vector<192x128xf32> to vector<64x128xf32>
    %17 = arith.addf %15, %16 : vector<64x128xf32>
    %18 = vector.extract_strided_slice %17 {offsets = [0, 0], sizes = [8, 128], strides = [1, 1]} : vector<64x128xf32> to vector<8x128xf32>
    %c1_i32 = arith.constant 1 : i32
    %19 = vector.broadcast %c1_i32 : i32 to vector<1x128xi32>
    %20 = arith.cmpi eq, %4, %19 : vector<1x128xi32>
    %21 = vector.extract_strided_slice %17 {offsets = [8, 0], sizes = [8, 128], strides = [1, 1]} : vector<64x128xf32> to vector<8x128xf32>
    %22 = vector.shape_cast %20 : vector<1x128xi1> to vector<1x128xi1>
    %23 = vector.broadcast %22 : vector<1x128xi1> to vector<8x128xi1>
    %24 = arith.select %23, %21, %18 : vector<8x128xi1>, vector<8x128xf32>
    %c2_i32 = arith.constant 2 : i32
    %25 = vector.broadcast %c2_i32 : i32 to vector<1x128xi32>
    %26 = arith.cmpi eq, %4, %25 : vector<1x128xi32>
    %27 = vector.extract_strided_slice %17 {offsets = [16, 0], sizes = [8, 128], strides = [1, 1]} : vector<64x128xf32> to vector<8x128xf32>
    %28 = vector.shape_cast %26 : vector<1x128xi1> to vector<1x128xi1>
    %29 = vector.broadcast %28 : vector<1x128xi1> to vector<8x128xi1>
    %30 = arith.select %29, %27, %24 : vector<8x128xi1>, vector<8x128xf32>
    %c3_i32_3 = arith.constant 3 : i32
    %31 = vector.broadcast %c3_i32_3 : i32 to vector<1x128xi32>
    %32 = arith.cmpi eq, %4, %31 : vector<1x128xi32>
    %33 = vector.extract_strided_slice %17 {offsets = [24, 0], sizes = [8, 128], strides = [1, 1]} : vector<64x128xf32> to vector<8x128xf32>
    %34 = vector.shape_cast %32 : vector<1x128xi1> to vector<1x128xi1>
    %35 = vector.broadcast %34 : vector<1x128xi1> to vector<8x128xi1>
    %36 = arith.select %35, %33, %30 : vector<8x128xi1>, vector<8x128xf32>
    %c4_i32 = arith.constant 4 : i32
    %37 = vector.broadcast %c4_i32 : i32 to vector<1x128xi32>
    %38 = arith.cmpi eq, %4, %37 : vector<1x128xi32>
    %39 = vector.extract_strided_slice %17 {offsets = [32, 0], sizes = [8, 128], strides = [1, 1]} : vector<64x128xf32> to vector<8x128xf32>
    %40 = vector.shape_cast %38 : vector<1x128xi1> to vector<1x128xi1>
    %41 = vector.broadcast %40 : vector<1x128xi1> to vector<8x128xi1>
    %42 = arith.select %41, %39, %36 : vector<8x128xi1>, vector<8x128xf32>
    %c5_i32 = arith.constant 5 : i32
    %43 = vector.broadcast %c5_i32 : i32 to vector<1x128xi32>
    %44 = arith.cmpi eq, %4, %43 : vector<1x128xi32>
    %45 = vector.extract_strided_slice %17 {offsets = [40, 0], sizes = [8, 128], strides = [1, 1]} : vector<64x128xf32> to vector<8x128xf32>
    %46 = vector.shape_cast %44 : vector<1x128xi1> to vector<1x128xi1>
    %47 = vector.broadcast %46 : vector<1x128xi1> to vector<8x128xi1>
    %48 = arith.select %47, %45, %42 : vector<8x128xi1>, vector<8x128xf32>
    %c6_i32 = arith.constant 6 : i32
    %49 = vector.broadcast %c6_i32 : i32 to vector<1x128xi32>
    %50 = arith.cmpi eq, %4, %49 : vector<1x128xi32>
    %51 = vector.extract_strided_slice %17 {offsets = [48, 0], sizes = [8, 128], strides = [1, 1]} : vector<64x128xf32> to vector<8x128xf32>
    %52 = vector.shape_cast %50 : vector<1x128xi1> to vector<1x128xi1>
    %53 = vector.broadcast %52 : vector<1x128xi1> to vector<8x128xi1>
    %54 = arith.select %53, %51, %48 : vector<8x128xi1>, vector<8x128xf32>
    %c7_i32_4 = arith.constant 7 : i32
    %55 = vector.broadcast %c7_i32_4 : i32 to vector<1x128xi32>
    %56 = arith.cmpi eq, %4, %55 : vector<1x128xi32>
    %57 = vector.extract_strided_slice %17 {offsets = [56, 0], sizes = [8, 128], strides = [1, 1]} : vector<64x128xf32> to vector<8x128xf32>
    %58 = vector.shape_cast %56 : vector<1x128xi1> to vector<1x128xi1>
    %59 = vector.broadcast %58 : vector<1x128xi1> to vector<8x128xi1>
    %60 = arith.select %59, %57, %54 : vector<8x128xi1>, vector<8x128xf32>
    %c0_5 = arith.constant 0 : index
    %c0_6 = arith.constant 0 : index
    %61 = vector.load %arg3[%c0_5, %c0_6] : memref<8x128xf32, #tpu.memory_space<vmem>>, vector<8x128xf32>
    tpu.vector_store %arg3[%c0_5, %c0_6], %60 {strides = array<i32>} : memref<8x128xf32, #tpu.memory_space<vmem>>, vector<8x128xf32>,
    return
  }
  func.func @transform_0(%arg0: i32) -> (i32, i32) {
    %c0_i32 = arith.constant 0 : i32
    %c0_i32_0 = arith.constant 0 : i32
    return %c0_i32, %arg0 : i32, i32
  }
  func.func @transform_1(%arg0: i32) -> (i32, i32) {
    %c0_i32 = arith.constant 0 : i32
    %c0_i32_0 = arith.constant 0 : i32
    %c0_i32_1 = arith.constant 0 : i32
    return %c0_i32, %c0_i32_0 : i32, i32
  }
  func.func @transform_2(%arg0: i32) -> (i32, i32) {
    %c0_i32 = arith.constant 0 : i32
    %c0_i32_0 = arith.constant 0 : i32
    return %c0_i32, %arg0 : i32, i32
  }
}

</mosaic_0001>

<bundles_post_ra>
// kernel: tpu_custom_call.1
= control target key start
LH: loop header
LB: loop body
LE: loop exit
PB: predicated region body
PF: predicated region fallthrough
CT: control target
= control target key end

     0   :  { %7 = vsyncpa [#allocation3], 0  ;;  %s670_s0 = inlined_call_operand.hbm [shape: s32[1,128], index: 0, kind: input, shape index: {}]   ;;  %s671_s1 = inlined_call_operand.hbm [shape: bf16[192,128], index: 1, kind: input, shape index: {}]   ;;  %s672_s2 = inlined_call_operand.hbm [shape: f32[8,128], index: 2, kind: output, shape index: {}]  }
   0x1   :  { %8 = vsyncpa [#allocation6], 0 }
   0x2   :  { %9 = vsyncpa [#allocation4], 0  ;;  %s15_s11 = sshll.u32 %s670_s0, 4  ;;  %s555_s12 = smov [#allocation2]   ;;  %s16_s11 = int_to_ptr.hbm [resolvable:$true] %s15_s11 }
   0x3   :  { %s17_s13 = sshll.u32 %s555_s12, 4  ;;  %s25_s16 = sshll.u32 %s671_s1, 4  ;;  %s18_s13 = int_to_ptr.vmem [resolvable:$true] %s17_s13  ;;  %s26_s16 = int_to_ptr.hbm [resolvable:$true] %s25_s16 }
   0x4   :  { %20 = dma.hbm_to_vmem [thread:$0]  %s16_s11, 16, %s18_s13, [#allocation3]  }
   0x5   :  { %s556_s17 = smov [#allocation5]   ;;  %s557_s19 = smov 64  }
   0x6   :  { %s27_s18 = sshll.u32 %s556_s17, 4  ;;  %s558_s20 = smov 4   ;;  %s28_s18 = int_to_ptr.vmem [resolvable:$true] %s27_s18 }
   0x7   :  { %33 = dma.hbm_to_vmem [thread:$0]  %s26_s16, 1536, %s28_s18, [#allocation6], %s557_s19, %s557_s19, %s558_s20  }
   0x8   :  { %549 = dma.done.wait [#allocation3], 16  }
   0x9   :  { %550 = vsyncadd [#allocation3], 4294967280 }
   0xa   :  { %551 = dma.done.wait [#allocation6], 1536  }
   0xb   :  { %552 = vsyncadd [#allocation6], 4294965760  ;;  %v45_v0 = vlaneseq  ;;  %v585_v2 = vld [vmem:[#allocation2] sm:$0x1]  ;;  %v559_v11 = vmov 1.0|1.0  }
   0xc   :  { %v43_v4 = vshra.s32 %v585_v2, 3  ;;  %v434_v21 = vld [vmem:[#allocation5] sm:$0xff]  ;;  %v437_v22 = vld [vmem:[#allocation5 + $0x18] sm:$0xff]  ;;  %v440_v23 = vld [vmem:[#allocation5 + $0x30] sm:$0xff]  ;;  %v44_v50 = vand.u32 7, %v585_v2  ;;  %v560_v53 = vmov 0  }
   0xd   :  { %v583_v1 = vshrl.u32 %v45_v0, 7  ;;  %v443_v24 = vld [vmem:[#allocation5 + $0x48] sm:$0xff]  ;;  %v438_v26 = vld [vmem:[#allocation5 + $0x20] sm:$0xff]  ;;  %v441_v27 = vld [vmem:[#allocation5 + $0x38] sm:$0xff]  ;;  %s561_s0 = smov [#allocation7]   ;;  %s343_s23 = sshll.u32 %s672_s2, 4  ;;  %s344_s23 = int_to_ptr.hbm [resolvable:$true] %s343_s23 }
   0xe   :  { %v592_v8 = vperm.slane %v43_v4, 0  ;;  %v435_v25 = vld [vmem:[#allocation5 + $0x8] sm:$0xff]  ;;  %v444_v28 = vld [vmem:[#allocation5 + $0x50] sm:$0xff]  ;;  %v442_v31 = vld [vmem:[#allocation5 + $0x40] sm:$0xff]  ;;  %s341_s1 = sshll.u32 %s561_s0, 4  ;;  %s342_s1 = int_to_ptr.vmem [resolvable:$true] %s341_s1 }
   0xf   :  { %v60_v3 = vadd.s32 112, %v583_v1  ;;  %v61_v5 = vadd.s32 120, %v583_v1  ;;  %v58_v6 = vadd.s32 96, %v583_v1  ;;  %v59_v7 = vadd.s32 104, %v583_v1  ;;  %v436_v29 = vld [vmem:[#allocation5 + $0x10] sm:$0xff]  ;;  %v439_v30 = vld [vmem:[#allocation5 + $0x28] sm:$0xff] }
  0x10   :  { %v56_v9 = vadd.s32 80, %v583_v1  ;;  %v57_v10 = vadd.s32 88, %v583_v1  ;;  %v54_v12 = vadd.s32 64, %v583_v1  ;;  %v55_v13 = vadd.s32 72, %v583_v1  ;;  %v445_v32 = vld [vmem:[#allocation5 + $0x58] sm:$0xff] }
  0x11   :  { %vm77_vm0 = vcmp.eq.s32.totalorder %v60_v3, %v592_v8  ;;  %vm78_vm1 = vcmp.eq.s32.totalorder %v61_v5, %v592_v8  ;;  %vm75_vm2 = vcmp.eq.s32.totalorder %v58_v6, %v592_v8  ;;  %vm76_vm3 = vcmp.eq.s32.totalorder %v59_v7, %v592_v8 }
  0x12   :  { %vm418_vm4 = vmpackc.low %vm78_vm1, %vm77_vm0  ;;  %vm73_vm6 = vcmp.eq.s32.totalorder %v56_v9, %v592_v8  ;;  %vm74_vm7 = vcmp.eq.s32.totalorder %v57_v10, %v592_v8  ;;  %vm71_vm9 = vcmp.eq.s32.totalorder %v54_v12, %v592_v8  ;;  %vm72_vm10 = vcmp.eq.s32.totalorder %v55_v13, %v592_v8 }
  0x13   :  { %419 = vmatpush.bf16.msk.msra.mxu0 %vm418_vm4, %v559_v11  ;;  %446 = vmatpush.bf16.msk.msra.mxu1 %vm418_vm4, %v559_v11  ;;  %vm420_vm5 = vmpackc.low %vm76_vm3, %vm75_vm2  ;;  %v52_v14 = vadd.s32 48, %v583_v1  ;;  %v53_v15 = vadd.s32 56, %v583_v1  ;;  %v50_v16 = vadd.s32 32, %v583_v1  ;;  %v51_v17 = vadd.s32 40, %v583_v1 }
  0x14   :  { %447 = vmatpush.bf16.msk.msra.mxu2 %vm418_vm4, %v559_v11  ;;  %448 = vmatpush.bf16.msk.msra.mxu3 %vm418_vm4, %v559_v11  ;;  %vm422_vm8 = vmpackc.low %vm74_vm7, %vm73_vm6  ;;  %v48_v18 = vadd.s32 16, %v583_v1  ;;  %v49_v19 = vadd.s32 24, %v583_v1  ;;  %v47_v20 = vadd.s32 8, %v583_v1 }
  0x15   :  { %vm424_vm11 = vmpackc.low %vm72_vm10, %vm71_vm9  ;;  %vm69_vm12 = vcmp.eq.s32.totalorder %v52_v14, %v592_v8  ;;  %vm70_vm13 = vcmp.eq.s32.totalorder %v53_v15, %v592_v8  ;;  %vm67_vm15 = vcmp.eq.s32.totalorder %v50_v16, %v592_v8  ;;  %vm68_vm0 = vcmp.eq.s32.totalorder %v51_v17, %v592_v8 }
  0x16   :  { %vm426_vm14 = vmpackc.low %vm70_vm13, %vm69_vm12  ;;  %vm65_vm2 = vcmp.eq.s32.totalorder %v48_v18, %v592_v8  ;;  %vm66_vm3 = vcmp.eq.s32.totalorder %v49_v19, %v592_v8  ;;  %vm64_vm6 = vcmp.eq.s32.totalorder %v47_v20, %v592_v8  ;;  %vm305_vm9 = vcmp.eq.s32.totalorder %v44_v50, 2 }
  0x17   :  { %421 = vmatpush.bf16.msk.msra.mxu0 %vm420_vm5, %v559_v11  ;;  %449 = vmatpush.bf16.msk.msra.mxu1 %vm420_vm5, %v559_v11  ;;  %vm428_vm1 = vmpackc.low %vm68_vm0, %vm67_vm15  ;;  %vm310_vm10 = vcmp.eq.s32.totalorder %v44_v50, 3  ;;  %v306_v55 = vsel %vm305_vm9, 1, %v560_v53  ;;  %vm320_vm12 = vcmp.eq.s32.totalorder %v44_v50, 5  ;;  %vm325_vm13 = vcmp.eq.s32.totalorder %v44_v50, 6 }
  0x18   :  { %450 = vmatpush.bf16.msk.msra.mxu2 %vm420_vm5, %v559_v11  ;;  %451 = vmatpush.bf16.msk.msra.mxu3 %vm420_vm5, %v559_v11  ;;  %vm430_vm4 = vmpackc.low %vm66_vm3, %vm65_vm2  ;;  %vm63_vm5 = vcmp.eq.s32.totalorder %v583_v1, %v592_v8  ;;  %v311_v57 = vsel %vm310_vm10, 1, %v560_v53  ;;  %v307_v60 = vperm.slane %v306_v55, 0  ;;  %v321_v62 = vsel %vm320_vm12, 1, %v560_v53 }
  0x19   :  { %vm432_vm7 = vmpackc.low %vm64_vm6, %vm63_vm5  ;;  %v312_v2 = vperm.slane %v311_v57, 0  ;;  %v326_v3 = vsel %vm325_vm13, 1, %v560_v53 }
  0x1a   :  { %vm308_vm0 = vcmp.eq.s32.totalorder %v307_v60, 1  ;;  %v327_v15 = vperm.slane %v326_v3, 0 }
  0x1b   :  { %423 = vmatpush.bf16.msk.msra.mxu0 %vm422_vm8, %v559_v11  ;;  %452 = vmatpush.bf16.msk.msra.mxu1 %vm422_vm8, %v559_v11 }
  0x1c   :  { %453 = vmatpush.bf16.msk.msra.mxu2 %vm422_vm8, %v559_v11  ;;  %454 = vmatpush.bf16.msk.msra.mxu3 %vm422_vm8, %v559_v11  ;;  %vm300_vm8 = vcmp.eq.s32.totalorder %v44_v50, 1 }
  0x1d   :  { %v301_v54 = vsel %vm300_vm8, 1, %v560_v53 }
  0x1e   :  { %v302_v59 = vperm.slane %v301_v54, 0 }
  0x1f   :  { %425 = vmatpush.bf16.msk.msra.mxu0 %vm424_vm11, %v559_v11  ;;  %455 = vmatpush.bf16.msk.msra.mxu1 %vm424_vm11, %v559_v11 }
  0x20   :  { %456 = vmatpush.bf16.msk.msra.mxu2 %vm424_vm11, %v559_v11  ;;  %457 = vmatpush.bf16.msk.msra.mxu3 %vm424_vm11, %v559_v11  ;;  %vm315_vm11 = vcmp.eq.s32.totalorder %v44_v50, 4  ;;  %vm655_vm15 = vcmp.eq.s32.totalorder %v302_v59, 1 }
  0x21   :  { %v316_v61 = vsel %vm315_vm11, 1, %v560_v53 }
  0x22   :  { %v317_v6 = vperm.slane %v316_v61, 0 }
  0x23   :  { %427 = vmatpush.bf16.msk.msra.mxu0 %vm426_vm14, %v559_v11  ;;  %458 = vmatpush.bf16.msk.msra.mxu1 %vm426_vm14, %v559_v11 }
  0x24   :  { %459 = vmatpush.bf16.msk.msra.mxu2 %vm426_vm14, %v559_v11  ;;  %460 = vmatpush.bf16.msk.msra.mxu3 %vm426_vm14, %v559_v11  ;;  %vm330_vm14 = vcmp.eq.s32.totalorder %v44_v50, 7  ;;  %vm318_vm2 = vcmp.eq.s32.totalorder %v317_v6, 1 }
  0x25   :  { %v331_v7 = vsel %vm330_vm14, 1, %v560_v53 }
  0x26   :  { %v332_v18 = vperm.slane %v331_v7, 0 }
  0x27   :  { %429 = vmatpush.bf16.msk.msra.mxu0 %vm428_vm1, %v559_v11  ;;  %461 = vmatpush.bf16.msk.msra.mxu1 %vm428_vm1, %v559_v11 }
  0x28   :  { %462 = vmatpush.bf16.msk.msra.mxu2 %vm428_vm1, %v559_v11  ;;  %463 = vmatpush.bf16.msk.msra.mxu3 %vm428_vm1, %v559_v11  ;;  %vm659_vm1 = vcmp.eq.s32.totalorder %v312_v2, 1  ;;  %vm333_vm5 = vcmp.eq.s32.totalorder %v332_v18, 1 }
  0x2b   :  { %431 = vmatpush.bf16.msk.msra.mxu0 %vm430_vm4, %v559_v11  ;;  %464 = vmatpush.bf16.msk.msra.mxu1 %vm430_vm4, %v559_v11 }
  0x2c   :  { %465 = vmatpush.bf16.msk.msra.mxu2 %vm430_vm4, %v559_v11  ;;  %466 = vmatpush.bf16.msk.msra.mxu3 %vm430_vm4, %v559_v11  ;;  %vm328_vm4 = vcmp.eq.s32.totalorder %v327_v15, 1 }
  0x2f   :  { %433 = vmatpush.bf16.msk.msra.mxu0 %vm432_vm7, %v559_v11  ;;  %467 = vmatpush.bf16.msk.msra.mxu1 %vm432_vm7, %v559_v11 }
  0x30   :  { %468 = vmatpush.bf16.msk.msra.mxu2 %vm432_vm7, %v559_v11  ;;  %469 = vmatpush.bf16.msk.msra.mxu3 %vm432_vm7, %v559_v11  ;;  %v322_v11 = vperm.slane %v321_v62, 0 }
  0x32   :  { %223 = vmatmul.bf16.vlgmr.msra.gmra.mxu0 %v434_v21  ;;  %238 = vmatmul.bf16.vlgmr.msra.gmra.mxu1 %v437_v22  ;;  %vm323_vm3 = vcmp.eq.s32.totalorder %v322_v11, 1 }
  0x33   :  { %253 = vmatmul.bf16.vlgmr.msra.gmra.mxu2 %v440_v23  ;;  %268 = vmatmul.bf16.vlgmr.msra.gmra.mxu3 %v443_v24 }
  0x42   :  { %228 = vmatmul.bf16.gmra.mxu0 %v435_v25  ;;  %243 = vmatmul.bf16.gmra.mxu1 %v438_v26 }
  0x43   :  { %258 = vmatmul.bf16.gmra.mxu2 %v441_v27  ;;  %273 = vmatmul.bf16.gmra.mxu3 %v444_v28 }
  0x52   :  { %233 = vmatmul.bf16.gmra.mxu0 %v436_v29  ;;  %248 = vmatmul.bf16.gmra.mxu1 %v439_v30 }
  0x53   :  { %263 = vmatmul.bf16.gmra.mxu2 %v442_v31  ;;  %278 = vmatmul.bf16.gmra.mxu3 %v445_v32 }
  0xaf   :  { %v224_v33 = vpop.f32.mrf.mxu0  ;;  %v239_v34 = vpop.f32.mrf.mxu1 }
  0xb6   :  { %v254_v35 = vpop.f32.mrf.mxu2  ;;  %v269_v36 = vpop.f32.mrf.mxu3 }
  0xb7   :  { %v226_v37 = vpop.f32.mrf.mxu0  ;;  %v241_v38 = vpop.f32.mrf.mxu1 }
  0xbe   :  { %v256_v39 = vpop.f32.mrf.mxu2  ;;  %v271_v40 = vpop.f32.mrf.mxu3 }
  0xbf   :  { %v229_v41 = vpop.f32.mrf.mxu0  ;;  %v244_v42 = vpop.f32.mrf.mxu1 }
  0xc0   :  { %v284_v63 = vadd.f32 %v244_v42, %v224_v33 }
  0xc6   :  { %v259_v43 = vpop.f32.mrf.mxu2  ;;  %v274_v44 = vpop.f32.mrf.mxu3 }
  0xc7   :  { %v246_v45 = vpop.f32.mrf.mxu1  ;;  %v231_v46 = vpop.f32.mrf.mxu0  ;;  %v290_v21 = vadd.f32 %v259_v43, %v239_v34 }
  0xc8   :  { %v285_v4 = vadd.f32 %v246_v45, %v226_v37 }
  0xce   :  { %v261_v47 = vpop.f32.mrf.mxu2  ;;  %v276_v48 = vpop.f32.mrf.mxu3 }
  0xcf   :  { %v249_v49 = vpop.f32.mrf.mxu1  ;;  %v234_v51 = vpop.f32.mrf.mxu0  ;;  %v291_v25 = vadd.f32 %v261_v47, %v241_v38 }
  0xd0   :  { %v286_v0 = vadd.f32 %v249_v49, %v229_v41  ;;  %v288_v8 = vadd.f32 %v254_v35, %v234_v51 }
  0xd2   :  { %v294_v16 = vadd.f32 %v286_v0, %v269_v36  ;;  %v296_v22 = vadd.f32 %v288_v8, %v274_v44 }
  0xd6   :  { %v264_v52 = vpop.f32.mrf.mxu2  ;;  %v279_v56 = vpop.f32.mrf.mxu3 }
  0xd7   :  { %v251_v58 = vpop.f32.mrf.mxu1  ;;  %v236_v1 = vpop.f32.mrf.mxu0  ;;  %v292_v12 = vadd.f32 %v284_v63, %v264_v52  ;;  %v298_v28 = vadd.f32 %v290_v21, %v279_v56 }
  0xd8   :  { %v287_v5 = vadd.f32 %v251_v58, %v231_v46  ;;  %v289_v13 = vadd.f32 %v256_v39, %v236_v1 }
  0xda   :  { %v295_v19 = vadd.f32 %v287_v5, %v271_v40  ;;  %v297_v26 = vadd.f32 %v289_v13, %v276_v48 }
  0xde   :  { %v266_v9 = vpop.f32.mrf.mxu2  ;;  %v281_v24 = vpop.f32.mrf.mxu3 }
  0xdf   :  { %v293_v14 = vadd.f32 %v285_v4, %v266_v9  ;;  %v299_v30 = vadd.f32 %v291_v25, %v281_v24 }
  0xe1   :  { %v304_v20 = vsel %vm655_vm15, %v293_v14, %v292_v12 }
  0xe2   :  { %v309_v23 = vsel %vm308_vm0, %v294_v16, %v304_v20 }
  0xe3   :  { %v314_v27 = vsel %vm659_vm1, %v295_v19, %v309_v23 }
  0xe4   :  { %v319_v29 = vsel %vm318_vm2, %v296_v22, %v314_v27 }
  0xe5   :  { %v324_v31 = vsel %vm323_vm3, %v297_v26, %v319_v29 }
  0xe6   :  { %v329_v32 = vsel %vm328_vm4, %v298_v28, %v324_v31 }
  0xe7   :  { %v334_v33 = vsel %vm333_vm5, %v299_v30, %v329_v32 }
  0xe8   :  { %335 = vst [vmem:[#allocation7] sm:$0xff] %v334_v33 }
  0xe9   :  { %346 = dma.vmem_to_hbm [thread:$0]  %s342_s1, 128, %s344_s23, [#allocation4]  }
  0xea   :  { %553 = dma.done.wait [#allocation4], 128  }
  0xeb   :  { %554 = vsyncadd [#allocation4], 4294967168 }
  0xec   :  { %351 = vsyncpa [#allocation3], 1 }
  0xed   :  { %352 = vsyncpa [#allocation6], 1 }
  0xee   :  { %353 = vsyncpa [#allocation4], 1 }

</bundles_post_ra>
